<compile_context>
chip_gen: v5e
topology: v5e:2x2
jax: 0.10.0
libtpu: 0.0.40
codegen_flags: <defaults>
</compile_context>

<pallas_src>
import functools

import jax
import jax.numpy as jnp
from jax.experimental import pallas as pl
from jax.experimental.pallas import tpu as pltpu


# ---------------------------------------------------------------------------
# helpers
# ---------------------------------------------------------------------------
def _largest_divisor_leq(n, cap):
    """Largest divisor of n that is <= cap."""
    c = int(max(1, min(n, cap)))
    while n % c:
        c -= 1
    return c


def _choose_class_block(n_cls, per_class_bytes, target_bytes):
    """Classes per grid step targeting ~target_bytes per output tile.

    Prefer an even divisor of n_cls (no masked final block) when a good one
    exists near the cap; otherwise take the full cap and let Pallas mask the
    partial tail instead of degenerating to tiny per-step tiles (e.g. when
    n_cls is prime, as in 101-class datasets).
    """
    cap = int(max(1, min(n_cls, target_bytes // max(per_class_bytes, 1))))
    div = _largest_divisor_leq(n_cls, cap)
    return div if 2 * div >= cap else cap


# ---------------------------------------------------------------------------
# Kernel 1: blocked concat (exact semantics of PromptLearner.forward()).
# ---------------------------------------------------------------------------
def _prompt_concat_kernel(prefix_ref, ctx_ref, suffix_ref, out_ref):
    # prefix_ref : (C, 1, D)         per-class SOS embedding for this class block
    # ctx_ref    : (n_ctx, D)        shared learned context (constant block index)
    # suffix_ref : (C, suf_len, D)   per-class name/EOS/pad embeddings
    # out_ref    : (C, total_len, D)
    c = out_ref.shape[0]
    n_ctx, d = ctx_ref.shape
    suf_len = suffix_ref.shape[1]

    # Broadcast the shared context across the class (leading) axis.
    ctx_b = jnp.broadcast_to(ctx_ref[...][None, :, :], (c, n_ctx, d))

    # Sequence layout: [0,1) prefix | [1, 1+n_ctx) ctx | [1+n_ctx, total) suffix.
    # NOTE: offsets 1 and 1+n_ctx are not sublane(8)-aligned, so these lower to
    # masked sublane stores; with a lane-dense D (multiple of 128) and multi-MB
    # class blocks the kernel is HBM-DMA bound, so the store path is not the
    # binding slot.  We keep three simple slice stores (folding prefix+ctx via
    # an in-kernel concatenate would only halve the masked stores and adds a
    # non-minor-axis concat lowering that is not worth the risk here).
    out_ref[:, :1, :] = prefix_ref[...].astype(out_ref.dtype)
    out_ref[:, 1:1 + n_ctx, :] = ctx_b.astype(out_ref.dtype)
    out_ref[:, 1 + n_ctx:1 + n_ctx + suf_len, :] = suffix_ref[...].astype(out_ref.dtype)


def prompt_learner_forward(token_prefix, ctx, token_suffix,
                           target_block_bytes=8 << 20):
    """Pallas equivalent of PromptLearner.forward().

    prompts[c] = concat([token_prefix[c], ctx, token_suffix[c]], axis=0)
    """
    n_cls, _, ctx_dim = token_prefix.shape
    n_ctx = ctx.shape[0]
    suf_len = token_suffix.shape[1]
    total_len = 1 + n_ctx + suf_len
    out_dtype = token_prefix.dtype            # embedding dtype, per the module
    itemsize = jnp.dtype(out_dtype).itemsize

    # Pack C classes per grid step so each output tile is ~8 MiB: per-step
    # overhead (~0.35us) otherwise dominates this pure copy, especially on
    # v7x's ~3.2 TB/s HBM.  Worst-case VMEM at real CLIP shapes (total_len=77,
    # D=512, f32) is ~2 * (out + suffix + prefix) tiles ~= 29 MiB, which the
    # explicit 40 MiB scoped-VMEM override below covers on every generation
    # (v5e/v6e have 128 MiB physical, v7x has 64 MiB).
    c_blk = _choose_class_block(n_cls, total_len * ctx_dim * itemsize,
                                target_block_bytes)
    grid = (pl.cdiv(n_cls, c_blk),)

    return pl.pallas_call(
        _prompt_concat_kernel,
        out_shape=jax.ShapeDtypeStruct((n_cls, total_len, ctx_dim), out_dtype),
        grid_spec=pltpu.PrefetchScalarGridSpec(
            num_scalar_prefetch=0,
            grid=grid,
            in_specs=[
                # per-class-block prefix rows
                pl.BlockSpec((c_blk, 1, ctx_dim), lambda i: (i, 0, 0)),
                # shared learned context: constant block index -> DMA'd once and
                # reused on every grid step (no re-fetch).
                pl.BlockSpec((n_ctx, ctx_dim), lambda i: (0, 0)),
                # per-class-block suffix rows
                pl.BlockSpec((c_blk, suf_len, ctx_dim), lambda i: (i, 0, 0)),
            ],
            out_specs=pl.BlockSpec((c_blk, total_len, ctx_dim),
                                   lambda i: (i, 0, 0)),
        ),
        compiler_params=pltpu.CompilerParams(
            # Class blocks are independent -> megacore shards them across the
            # two TensorCores on v7x; no-op on single-TC v5e/v6e.
            dimension_semantics=("parallel",),
            # Keep full double-buffering of the ~8 MiB tiles on v5e (16 MiB
            # scoped default) while staying well under v7x's 64 MiB physical.
            vmem_limit_bytes=40 << 20,
        ),
    )(token_prefix, ctx.astype(out_dtype), token_suffix)


# ---------------------------------------------------------------------------
# Kernel 2: P8 aliased fast path -- write only the ctx rows into the embedding.
# ---------------------------------------------------------------------------
def _ctx_scatter_kernel(emb_ref, ctx_ref, out_ref, sem_ref, *, c_blk):
    # emb_ref  : (n_cls, total_len, D) full prompt embedding in HBM (alias of out_ref)
    # ctx_ref  : (n_ctx, D) shared learned context in VMEM (constant block index)
    # out_ref  : same HBM buffer as emb_ref (input_output_aliases={0: 0})
    # sem_ref  : (1,) DMA semaphore
    del emb_ref  # prefix/suffix rows are already correct in the aliased buffer
    i = pl.program_id(0)
    n_cls = out_ref.shape[0]
    n_ctx = ctx_ref.shape[0]
    base = i * c_blk
    # Tail block may be partial when c_blk does not divide n_cls.
    cnt = jnp.minimum(c_blk, n_cls - base)

    # Issue one contiguous ~n_ctx*D DMA per class, straight from the shared ctx
    # VMEM block into rows [1, 1+n_ctx) of that class.  No broadcast, no staging
    # scratch, no per-step VPU work: the body is pure DMA issue.  All copies in
    # a step are in flight concurrently; they are drained before the step ends
    # so each step is self-contained (safe under "parallel" megacore sharding).
    @pl.loop(0, cnt)
    def _issue(j):
        pltpu.make_async_copy(
            ctx_ref,
            out_ref.at[base + j, pl.ds(1, n_ctx), :],
            sem_ref.at[0],
        ).start()

    @pl.loop(0, cnt)
    def _drain(j):
        # Same-shaped descriptor; .wait() only needs the byte count.
        pltpu.make_async_copy(
            ctx_ref,
            out_ref.at[base, pl.ds(1, n_ctx), :],
            sem_ref.at[0],
        ).wait()


def prompt_learner_forward_inplace(embedding, ctx, target_block_bytes=8 << 20):
    """P8 fast path: same result as forward(), ~total_len/n_ctx less HBM traffic.

    `embedding` is clip_model.token_embedding(tokenized_prompts) -- the tensor
    PromptLearner slices token_prefix / token_suffix from.  Rows [1, 1+n_ctx)
    (the 'X' placeholder tokens) are overwritten with the learned ctx, which is
    exactly concat([prefix, ctx, suffix], dim=1).

    IMPORTANT: call under jit with the embedding donated (donate_argnums) so
    the input_output_aliases alias is a true in-place update; without donation
    the result is still correct but XLA inserts a full copy of the embedding
    and the HBM-traffic saving disappears.
    """
    n_cls, total_len, ctx_dim = embedding.shape
    n_ctx = ctx.shape[0]
    itemsize = jnp.dtype(embedding.dtype).itemsize

    # Classes per step: large (default ~8 MiB of writes per step, i.e. ~256
    # classes at CLIP shapes) so the single drain stall per step is amortized,
    # and NOT required to divide n_cls -- the tail is handled with a dynamic
    # count inside the kernel, avoiding the c_blk=1 degenerate case for prime
    # class counts.
    per_class_bytes = n_ctx * ctx_dim * itemsize
    c_blk = int(max(1, min(n_cls, target_block_bytes // max(per_class_bytes, 1))))
    grid = (pl.cdiv(n_cls, c_blk),)

    kernel = functools.partial(_ctx_scatter_kernel, c_blk=c_blk)

    return pl.pallas_call(
        kernel,
        out_shape=jax.ShapeDtypeStruct(embedding.shape, embedding.dtype),
        grid_spec=pltpu.PrefetchScalarGridSpec(
            num_scalar_prefetch=0,
            grid=grid,
            in_specs=[
                pl.BlockSpec(memory_space=pl.ANY),                 # embedding (HBM, aliased)
                pl.BlockSpec((n_ctx, ctx_dim), lambda i: (0, 0)),  # shared ctx (fetched once)
            ],
            out_specs=pl.BlockSpec(memory_space=pl.ANY),
            scratch_shapes=[
                pltpu.SemaphoreType.DMA((1,)),
            ],
        ),
        input_output_aliases={0: 0},
        compiler_params=pltpu.CompilerParams(
            # Each class block writes disjoint rows of the aliased HBM buffer
            # and every grid step is self-contained, so megacore sharding on
            # v7x is safe (~2x DMA issue/write bandwidth); no-op on v5e/v6e.
            dimension_semantics=("parallel",),
        ),
    )(embedding, ctx.astype(embedding.dtype))


# ---------------------------------------------------------------------------
# Pure-JAX reference (mirrors torch.cat([prefix, ctx.expand(...), suffix], dim=1)).
# ---------------------------------------------------------------------------
def reference_forward(token_prefix, ctx, token_suffix):
    n_cls = token_prefix.shape[0]
    ctx_exp = jnp.broadcast_to(ctx[None, :, :].astype(token_prefix.dtype),
                               (n_cls,) + ctx.shape)
    return jnp.concatenate([token_prefix, ctx_exp, token_suffix], axis=1)


if __name__ == "__main__":
    def run_case(n_cls, n_ctx, ctx_dim, suffix_len, seed,
                 concat_block_bytes, inplace_block_bytes):
        total_len = 1 + n_ctx + suffix_len
        dtype = jnp.float32

        key = jax.random.PRNGKey(seed)
        k_ctx, k_emb = jax.random.split(key)

        # nn.init.normal_(ctx_vectors, std=0.02)
        ctx = (0.02 * jax.random.normal(k_ctx, (n_ctx, ctx_dim))).astype(dtype)

        # Synthetic stand-in for clip_model.token_embedding(tokenized_prompts).
        # TODO(synk): the CLIP tokenizer + token_embedding lookup live in
        # __init__ and are host-side preprocessing, not part of forward();
        # random embeddings stand in.
        embedding = jax.random.normal(
            k_emb, (n_cls, total_len, ctx_dim)).astype(dtype)
        token_prefix = embedding[:, :1, :]            # buffer 'token_prefix'
        token_suffix = embedding[:, 1 + n_ctx:, :]    # buffer 'token_suffix'

        expected = reference_forward(token_prefix, ctx, token_suffix)

        # Path 1: module-faithful concat kernel.
        prompts = jax.block_until_ready(
            prompt_learner_forward(token_prefix, ctx, token_suffix,
                                   target_block_bytes=concat_block_bytes))
        assert prompts.shape == (n_cls, total_len, ctx_dim), prompts.shape
        assert prompts.dtype == dtype
        assert jnp.allclose(prompts, expected), "concat kernel mismatch vs reference"

        # Path 2: aliased in-place kernel (only the ctx rows are ever written).
        emb_donate = jnp.copy(embedding)              # donated below
        inplace_fn = jax.jit(
            functools.partial(prompt_learner_forward_inplace,
                              target_block_bytes=inplace_block_bytes),
            donate_argnums=(0,))
        prompts_inplace = jax.block_until_ready(inplace_fn(emb_donate, ctx))
        assert prompts_inplace.shape == (n_cls, total_len, ctx_dim)
        assert prompts_inplace.dtype == dtype
        assert jnp.allclose(prompts_inplace, expected), \
            "in-place kernel mismatch vs reference"

    # Small deterministic shapes consistent with PromptLearner.__init__ (real
    # CLIP uses ctx_dim=512, total_len=77).  ctx_dim is kept a multiple of 128
    # so the output is lane-dense, matching the real model.
    n_ctx, ctx_dim, suffix_len = 16, 128, 7
    per_class_concat = (1 + n_ctx + suffix_len) * ctx_dim * 4
    per_class_ctx = n_ctx * ctx_dim * 4

    # Case 1: everything fits in a single grid step (default block sizes).
    run_case(n_cls=4, n_ctx=n_ctx, ctx_dim=ctx_dim, suffix_len=suffix_len,
             seed=0, concat_block_bytes=8 << 20, inplace_block_bytes=8 << 20)

    # Case 2: prime-ish class count with tiny block budgets -> multi-step grid
    # with a partial (masked / dynamically counted) final block on both paths.
    run_case(n_cls=5, n_ctx=n_ctx, ctx_dim=ctx_dim, suffix_len=suffix_len,
             seed=1, concat_block_bytes=3 * per_class_concat,
             inplace_block_bytes=3 * per_class_ctx)

    print("KERNEL_OK")
</pallas_src>

<mosaic_0001>
module attributes {stable_mosaic.version = 11 : i64} {
  func.func @_prompt_concat_kernel(%arg0: i32, %arg1: memref<4x1x128xf32, #tpu.memory_space<vmem>>, %arg2: memref<16x128xf32, #tpu.memory_space<vmem>>, %arg3: memref<4x7x128xf32, #tpu.memory_space<vmem>>, %arg4: memref<4x24x128xf32, #tpu.memory_space<vmem>>) attributes {dimension_semantics = [#tpu.dimension_semantics<parallel>], iteration_bounds = array<i64: 1>, scalar_prefetch = 0 : i64, scratch_operands = 0 : i64, tpu.core_type = #tpu.core_type<tc>, window_params = [{transform_indices = @transform_0, window_bounds = array<i64: 4, 1, 128>}, {pipeline_mode = #tpu.pipeline_mode<synchronous>, transform_indices = @transform_1, window_bounds = array<i64: 16, 128>}, {transform_indices = @transform_2, window_bounds = array<i64: 4, 7, 128>}, {transform_indices = @transform_3, window_bounds = array<i64: 4, 24, 128>}]} {
    %c0 = arith.constant 0 : index
    %c0_0 = arith.constant 0 : index
    %0 = vector.load %arg2[%c0, %c0_0] : memref<16x128xf32, #tpu.memory_space<vmem>>, vector<16x128xf32>
    %1 = vector.shape_cast %0 : vector<16x128xf32> to vector<1x16x128xf32>
    %2 = vector.shape_cast %1 : vector<1x16x128xf32> to vector<1x16x128xf32>
    %3 = vector.broadcast %2 : vector<1x16x128xf32> to vector<4x16x128xf32>
    %c0_1 = arith.constant 0 : index
    %c0_2 = arith.constant 0 : index
    %c0_3 = arith.constant 0 : index
    %4 = vector.load %arg1[%c0_1, %c0_2, %c0_3] : memref<4x1x128xf32, #tpu.memory_space<vmem>>, vector<4x1x128xf32>
    %c0_4 = arith.constant 0 : index
    %c0_5 = arith.constant 0 : index
    %c0_6 = arith.constant 0 : index
    %5 = vector.load %arg4[%c0_4, %c0_5, %c0_6] : memref<4x24x128xf32, #tpu.memory_space<vmem>>, vector<4x1x128xf32>
    tpu.vector_store %arg4[%c0_4, %c0_5, %c0_6], %4 {strides = array<i32>} : memref<4x24x128xf32, #tpu.memory_space<vmem>>, vector<4x1x128xf32>,
    %c0_7 = arith.constant 0 : index
    %c1 = arith.constant 1 : index
    %c0_8 = arith.constant 0 : index
    %6 = vector.load %arg4[%c0_7, %c1, %c0_8] : memref<4x24x128xf32, #tpu.memory_space<vmem>>, vector<4x16x128xf32>
    tpu.vector_store %arg4[%c0_7, %c1, %c0_8], %3 {strides = array<i32>} : memref<4x24x128xf32, #tpu.memory_space<vmem>>, vector<4x16x128xf32>,
    %c0_9 = arith.constant 0 : index
    %c0_10 = arith.constant 0 : index
    %c0_11 = arith.constant 0 : index
    %7 = vector.load %arg3[%c0_9, %c0_10, %c0_11] : memref<4x7x128xf32, #tpu.memory_space<vmem>>, vector<4x7x128xf32>
    %c0_12 = arith.constant 0 : index
    %c17 = arith.constant 17 : index
    %c0_13 = arith.constant 0 : index
    %8 = vector.load %arg4[%c0_12, %c17, %c0_13] : memref<4x24x128xf32, #tpu.memory_space<vmem>>, vector<4x7x128xf32>
    tpu.vector_store %arg4[%c0_12, %c17, %c0_13], %7 {strides = array<i32>} : memref<4x24x128xf32, #tpu.memory_space<vmem>>, vector<4x7x128xf32>,
    return
  }
  func.func @transform_0(%arg0: i32) -> (i32, i32, i32) {
    %c0_i32 = arith.constant 0 : i32
    %c0_i32_0 = arith.constant 0 : i32
    %c0_i32_1 = arith.constant 0 : i32
    return %arg0, %c0_i32, %c0_i32_0 : i32, i32, i32
  }
  func.func @transform_1(%arg0: i32) -> (i32, i32) {
    %c0_i32 = arith.constant 0 : i32
    %c0_i32_0 = arith.constant 0 : i32
    %c0_i32_1 = arith.constant 0 : i32
    return %c0_i32, %c0_i32_0 : i32, i32
  }
  func.func @transform_2(%arg0: i32) -> (i32, i32, i32) {
    %c0_i32 = arith.constant 0 : i32
    %c0_i32_0 = arith.constant 0 : i32
    %c0_i32_1 = arith.constant 0 : i32
    return %arg0, %c0_i32, %c0_i32_0 : i32, i32, i32
  }
  func.func @transform_3(%arg0: i32) -> (i32, i32, i32) {
    %c0_i32 = arith.constant 0 : i32
    %c0_i32_0 = arith.constant 0 : i32
    %c0_i32_1 = arith.constant 0 : i32
    return %arg0, %c0_i32, %c0_i32_0 : i32, i32, i32
  }
}

</mosaic_0001>

<bundles_post_ra>
// kernel: tpu_custom_call.1
= control target key start
LH: loop header
LB: loop body
LE: loop exit
PB: predicated region body
PF: predicated region fallthrough
CT: control target
= control target key end

     0   :  { %s144_s0 = inlined_call_operand.vmem [shape: f32[4,1,128], index: 0, kind: input, shape index: {}]   ;;  %s145_s1 = inlined_call_operand.vmem [shape: f32[16,128], index: 1, kind: input, shape index: {}]   ;;  %s146_s2 = inlined_call_operand.vmem [shape: f32[4,7,128], index: 2, kind: input, shape index: {}]   ;;  %s147_s3 = inlined_call_operand.hbm [shape: f32[4,24,128], index: 3, kind: output, shape index: {}]  }
   0x1   :  { %v17_v0 = vld [vmem:[%s144_s0] sm:$0x1]  ;;  %v18_v1 = vld [vmem:[%s144_s0 + $0x1] sm:$0x1]  ;;  %v19_v2 = vld [vmem:[%s144_s0 + $0x2] sm:$0x1] }
   0x2   :  { %21 = vst [vmem:[#allocation2] sm:$0x1] %v17_v0  ;;  %v20_v3 = vld [vmem:[%s144_s0 + $0x3] sm:$0x1] }
   0x3   :  { %22 = vst [vmem:[#allocation2 + $0x18] sm:$0x1] %v18_v1  ;;  %v15_v4 = vld [vmem:[%s145_s1] sm:$0xff] }
   0x4   :  { %23 = vst [vmem:[#allocation2 + $0x30] sm:$0x1] %v19_v2 }
   0x5   :  { %24 = vst [vmem:[#allocation2 + $0x48] sm:$0x1] %v20_v3 }
   0x6   :  { %8 = vsyncpa [#allocation3], 0  ;;  %25 = vst [vmem:[#allocation2 + $0x1] sm:$0xff] %v15_v4  ;;  %v16_v5 = vld [vmem:[%s145_s1 + $0x8] sm:$0xff]  ;;  %v33_v6 = vld [vmem:[%s146_s2] sm:$0x7f] }
   0x7   :  { %27 = vst [vmem:[#allocation2 + $0x19] sm:$0xff] %v15_v4  ;;  %s88_s25 = smov [#allocation2]   ;;  %s47_s29 = sshll.u32 %s147_s3, 4  ;;  %v34_v7 = vld [vmem:[%s146_s2 + $0x8] sm:$0x7f]  ;;  %s48_s29 = int_to_ptr.hbm [resolvable:$true] %s47_s29 }
   0x8   :  { %29 = vst [vmem:[#allocation2 + $0x31] sm:$0xff] %v15_v4  ;;  %s45_s26 = sshll.u32 %s88_s25, 4  ;;  %v35_v8 = vld [vmem:[%s146_s2 + $0x10] sm:$0x7f]  ;;  %v36_v9 = vld [vmem:[%s146_s2 + $0x18] sm:$0x7f]  ;;  %s46_s26 = int_to_ptr.vmem [resolvable:$true] %s45_s26 }
   0x9   :  { %31 = vst [vmem:[#allocation2 + $0x49] sm:$0xff] %v15_v4  ;;  %s89_s3 = smov 128   ;;  %s90_s8 = smov 8  }
   0xa   :  { %26 = vst [vmem:[#allocation2 + $0x9] sm:$0xff] %v16_v5 }
   0xb   :  { %28 = vst [vmem:[#allocation2 + $0x21] sm:$0xff] %v16_v5 }
   0xc   :  { %30 = vst [vmem:[#allocation2 + $0x39] sm:$0xff] %v16_v5 }
   0xd   :  { %32 = vst [vmem:[#allocation2 + $0x51] sm:$0xff] %v16_v5 }
   0xe   :  { %37 = vst [vmem:[#allocation2 + $0x11] sm:$0x7f] %v33_v6 }
   0xf   :  { %38 = vst [vmem:[#allocation2 + $0x29] sm:$0x7f] %v34_v7 }
  0x10   :  { %39 = vst [vmem:[#allocation2 + $0x41] sm:$0x7f] %v35_v8 }
  0x11   :  { %40 = vst [vmem:[#allocation2 + $0x59] sm:$0x7f] %v36_v9 }
  0x12   :  { %53 = dma.vmem_to_hbm [thread:$0]  %s46_s26, 1536, %s48_s29, [#allocation3], %s89_s3, %s89_s3, %s90_s8  }
  0x13   :  { %86 = dma.done.wait [#allocation3], 1536  }
  0x14   :  { %87 = vsyncadd [#allocation3], 4294965760 }
  0x15   :  { %58 = vsyncpa [#allocation3], 1 }

</bundles_post_ra>
